<compile_context>
chip_gen: v7x
topology: tpu7x:2x2x1
jax: 0.10.0
libtpu: 0.0.40
codegen_flags: <defaults>
</compile_context>

<pallas_src>
import jax
import jax.numpy as jnp
from jax.experimental import pallas as pl
from jax.experimental.pallas import tpu as pltpu

LEAK = 0.2
EPS = 1e-5


def _lrelu(x):
    # max(x, 0.2*x): identical to LeakyReLU(0.2) for 0 < LEAK < 1, one op less.
    return jnp.maximum(x, LEAK * x)


def discriminator_kernel(
    x_ref,                             # (R, 9C)  bf16  im2col phases of x
    mask_ref,                          # (R, 1)   f32   0 at each batch's first row
    w1_ref, b1_ref,                    # (3C, D)  bf16, (1, D)  f32
    w2_ref, b2_ref, g2_ref, be2_ref,   # (3D, 2D) bf16, (1, 2D) f32 x3
    w3_ref, b3_ref, g3_ref, be3_ref,   # (6D, 4D) bf16, (1, 4D) f32 x3
    wfc_ref, bfc_ref,                  # (1, 4D)  f32,  (1, 1)  f32
    avg_ref,                           # (B, R)   bf16  per-batch temporal-mean matrix
    out_ref,                           # (B, 1)   f32
    h1_ref, h2_ref, h3_ref,            # bf16 scratch: (R, 5D), (R, 6D), (R, 4D)
):
    c = x_ref.shape[1] // 9            # input channels
    d1 = b1_ref.shape[1]               # D
    d2 = b2_ref.shape[1]               # 2D

    mask = mask_ref[...]               # (R, 1) f32

    def shift_down(v):
        # v[u-1] with the first row of every batch zeroed (conv's left zero pad).
        # Built once per layer on a single f32 phase plane before the bf16
        # store, so the copy is small and off the MXU critical path (and it
        # avoids packed-bf16 sublane rolls).
        zero = jnp.zeros((1, v.shape[1]), v.dtype)
        return jnp.concatenate([zero, v[:-1, :]], axis=0) * mask

    def col_mean(v):
        # Column mean via a ones-row MXU matmul (f32 operands): offloads the
        # axis-0 reduction from the VPU to the otherwise idle MXU slot.
        ones = jnp.ones((1, v.shape[0]), jnp.float32)
        return jnp.dot(ones, v, preferred_element_type=jnp.float32) / v.shape[0]

    def conv(tap_bf16, w_ref, b_ref):
        # Fused 3-tap conv: (R, 3*Cin) @ (3*Cin, Cout), f32 accumulation.
        return jnp.dot(tap_bf16, w_ref[...],
                       preferred_element_type=jnp.float32) + b_ref[...]

    # ---- Layer 1: Conv1d(C -> D) + LeakyReLU, 4 output phases. ----------------
    # h1 lanes: [ shift(p3) | p0 | p1 | p2 | p3 ]  so that layer 2's im2col
    # windows are the contiguous lane slices [0:3D] (even) and [2D:5D] (odd).
    for p in range(4):
        a = _lrelu(conv(x_ref[:, 2 * p * c:(2 * p + 3) * c], w1_ref, b1_ref))
        h1_ref[:, (p + 1) * d1:(p + 2) * d1] = a.astype(jnp.bfloat16)
        if p == 3:
            h1_ref[:, 0:d1] = shift_down(a).astype(jnp.bfloat16)

    # ---- Layer 2: Conv1d(D -> 2D) + BatchNorm + LeakyReLU, 2 output phases. ---
    e_raw = conv(h1_ref[:, 0:3 * d1], w2_ref, b2_ref)          # even time steps
    o_raw = conv(h1_ref[:, 2 * d1:5 * d1], w2_ref, b2_ref)     # odd time steps
    mu = 0.5 * (col_mean(e_raw) + col_mean(o_raw))
    ex2 = 0.5 * (col_mean(e_raw * e_raw) + col_mean(o_raw * o_raw))
    # NOTE: single-pass E[x^2]-mu^2 in f32 (documented: fine at these scales).
    scale = jax.lax.rsqrt(ex2 - mu * mu + EPS) * g2_ref[...]
    shift = be2_ref[...] - mu * scale
    e = _lrelu(e_raw * scale + shift)
    o = _lrelu(o_raw * scale + shift)
    # h2 lanes: [ shift(odd) | even | odd ] -> layer 3's window is [0:6D].
    h2_ref[:, d2:2 * d2] = e.astype(jnp.bfloat16)
    h2_ref[:, 2 * d2:3 * d2] = o.astype(jnp.bfloat16)
    h2_ref[:, 0:d2] = shift_down(o).astype(jnp.bfloat16)

    # ---- Layer 3: Conv1d(2D -> 4D) + BatchNorm + LeakyReLU (natural order). ---
    r_raw = conv(h2_ref[:, 0:3 * d2], w3_ref, b3_ref)          # (R, 4D) f32
    mu3 = col_mean(r_raw)
    ex23 = col_mean(r_raw * r_raw)
    scale3 = jax.lax.rsqrt(ex23 - mu3 * mu3 + EPS) * g3_ref[...]
    shift3 = be3_ref[...] - mu3 * scale3
    h3_ref[...] = _lrelu(r_raw * scale3 + shift3).astype(jnp.bfloat16)

    # ---- Temporal mean (per-batch averaging matmul) + Linear(4D -> 1). --------
    hm = jnp.dot(avg_ref[...], h3_ref[...],
                 preferred_element_type=jnp.float32)           # (B, 4D) f32
    out_ref[...] = (jnp.sum(hm * wfc_ref[...], axis=-1, keepdims=True)
                    + bfc_ref[...])


def discriminator_forward(x_ncw, params):
    """x_ncw: (B, C, L) float32, PyTorch NCW layout."""
    B, C, L = x_ncw.shape
    D = params["w1"].shape[0]
    # TODO(synk): lengths not divisible by 8 need per-batch tail padding; the
    # phase decomposition assumes every conv halves the length exactly.
    assert L % 8 == 0, "L must be divisible by 8"
    L3 = L // 8
    R = B * L3                         # flat row count shared by every plane

    # ---- wrapper-side layout plumbing (reshape/transpose only) ----
    x_nlc = jnp.transpose(x_ncw, (0, 2, 1)).astype(jnp.float32)   # (B, L, C)
    x_ph = x_nlc.reshape(B, L3, 8, C)                             # x[b, 8v+q, :]
    x_m1 = jnp.concatenate(                                       # x[b, 8v-1, :]
        [jnp.zeros((B, 1, C), x_ph.dtype), x_ph[:, :-1, 7, :]], axis=1)
    x_im2col = jnp.concatenate(
        [x_m1] + [x_ph[:, :, q, :] for q in range(8)], axis=-1
    ).reshape(R, 9 * C).astype(jnp.bfloat16)

    def stack_w(w):   # (Cout, Cin, 3) -> (3*Cin, Cout) bf16, taps stacked k=0,1,2
        return jnp.transpose(w, (2, 1, 0)).reshape(-1, w.shape[0]).astype(jnp.bfloat16)

    def row(a):
        return a.reshape(1, -1).astype(jnp.float32)

    w1, w2, w3 = stack_w(params["w1"]), stack_w(params["w2"]), stack_w(params["w3"])
    b1, b2, b3 = row(params["b1"]), row(params["b2"]), row(params["b3"])
    g2, be2 = row(params["g2"]), row(params["be2"])
    g3, be3 = row(params["g3"]), row(params["be3"])
    wfc = row(params["wfc"])
    bfc = params["bfc"].reshape(1, 1).astype(jnp.float32)

    # Batch-start mask column (zeroes the conv left tap at each batch's row 0).
    mask = (jnp.arange(R) % L3 != 0).astype(jnp.float32).reshape(R, 1)
    # Per-batch temporal-mean matrix (entries 1/L3), bf16 MXU operand.
    avg = (jnp.repeat(jnp.eye(B, dtype=jnp.float32), L3, axis=1)
           / float(L3)).astype(jnp.bfloat16)

    # VMEM budget: bf16 activations + weights + f32 live temporaries with
    # head-room; capped at 56 MiB so it is safe on v7x (64 MiB physical).  On
    # v5e/v6e this could be raised toward ~100 MiB for very large B*L, but at
    # that point layer 1 should be pipelined from HBM instead (TODO below).
    act_bytes = R * (9 * C + 5 * D + 6 * D + 4 * D) * 2
    live_bytes = R * 4 * D * 4 * 6
    w_bytes = (3 * C * D + 6 * D * D + 24 * D * D) * 2 + 64 * D * 4
    vmem_limit = int(min(max(2 * (act_bytes + live_bytes + w_bytes), 32 << 20),
                         56 << 20))

    # TODO(synk): for large B*L keep x in HBM (memory_space=pl.ANY) and pipeline
    # layer 1 over row chunks with pltpu.emit_pipeline (double-buffered).
    # TODO(synk): on v7x, split the row dimension over the 2 TensorCores
    # (pl.core_map / core-parallel grid axis) and combine BN partial sums.
    vmem = pl.BlockSpec(memory_space=pltpu.MemorySpace.VMEM)
    return pl.pallas_call(
        discriminator_kernel,
        out_shape=jax.ShapeDtypeStruct((B, 1), jnp.float32),
        in_specs=[vmem] * 15,
        out_specs=vmem,
        scratch_shapes=[
            pltpu.VMEM((R, 5 * D), jnp.bfloat16),
            pltpu.VMEM((R, 6 * D), jnp.bfloat16),
            pltpu.VMEM((R, 4 * D), jnp.bfloat16),
        ],
        compiler_params=pltpu.CompilerParams(vmem_limit_bytes=vmem_limit),
    )(x_im2col, mask, w1, b1, w2, b2, g2, be2, w3, b3, g3, be3, wfc, bfc, avg)


def reference_forward(x, p):
    """Pure-JAX reference (mirrors the PyTorch module, training-mode BN)."""
    hi = jax.lax.Precision.HIGHEST

    def conv1d(h, w, b):
        y = jax.lax.conv_general_dilated(
            h, w, window_strides=(2,), padding=((1, 1),),
            dimension_numbers=("NCH", "OIH", "NCH"), precision=hi)
        return y + b[None, :, None]

    def bn(h, g, be):
        mu = jnp.mean(h, axis=(0, 2), keepdims=True)
        var = jnp.mean((h - mu) ** 2, axis=(0, 2), keepdims=True)
        return (h - mu) / jnp.sqrt(var + EPS) * g[None, :, None] + be[None, :, None]

    h = _lrelu(conv1d(x, p["w1"], p["b1"]))
    h = _lrelu(bn(conv1d(h, p["w2"], p["b2"]), p["g2"], p["be2"]))
    h = _lrelu(bn(conv1d(h, p["w3"], p["b3"]), p["g3"], p["be3"]))
    hm = jnp.mean(h, axis=2)
    return jnp.dot(hm, p["wfc"].T, precision=hi) + p["bfc"][None, :]


def init_params(key, channels, dimension):
    D = dimension
    ks = jax.random.split(key, 12)

    def w(k, shape, scale=0.1):
        return (scale * jax.random.normal(k, shape)).astype(jnp.float32)

    return dict(
        w1=w(ks[0], (D, channels, 3)),      b1=w(ks[1], (D,)),
        w2=w(ks[2], (2 * D, D, 3)),         b2=w(ks[3], (2 * D,)),
        g2=(1.0 + 0.1 * jax.random.normal(ks[4], (2 * D,))).astype(jnp.float32),
        be2=w(ks[5], (2 * D,)),
        w3=w(ks[6], (4 * D, 2 * D, 3)),     b3=w(ks[7], (4 * D,)),
        g3=(1.0 + 0.1 * jax.random.normal(ks[8], (4 * D,))).astype(jnp.float32),
        be3=w(ks[9], (4 * D,)),
        wfc=w(ks[10], (1, 4 * D)),          bfc=w(ks[11], (1,)),
    )


if __name__ == "__main__":
    key = jax.random.PRNGKey(0)
    kx, kp = jax.random.split(key)

    # Small shapes consistent with the module (NCW input, channels=dimension).
    B, C, L = 2, 8, 32
    D = 8  # "dimension" hyper-parameter

    x = jax.random.normal(kx, (B, C, L), dtype=jnp.float32)
    params = init_params(kp, C, D)

    out = discriminator_forward(x, params)
    out = jax.block_until_ready(out)

    ref = reference_forward(x, params)
    assert out.shape == (B, 1), out.shape
    # bf16 MXU operands vs the f32 HIGHEST reference: ~1e-3-level drift is the
    # documented, intended trade-off for a GAN discriminator forward.
    assert jnp.allclose(out, ref, atol=2e-2, rtol=2e-2), (out, ref)

    print("KERNEL_OK")
</pallas_src>

<mosaic_0001>
module attributes {stable_mosaic.version = 11 : i64} {
  func.func @discriminator_kernel(%arg0: memref<8x72xbf16, #tpu.memory_space<vmem>>, %arg1: memref<8x1xf32, #tpu.memory_space<vmem>>, %arg2: memref<24x8xbf16, #tpu.memory_space<vmem>>, %arg3: memref<1x8xf32, #tpu.memory_space<vmem>>, %arg4: memref<24x16xbf16, #tpu.memory_space<vmem>>, %arg5: memref<1x16xf32, #tpu.memory_space<vmem>>, %arg6: memref<1x16xf32, #tpu.memory_space<vmem>>, %arg7: memref<1x16xf32, #tpu.memory_space<vmem>>, %arg8: memref<48x32xbf16, #tpu.memory_space<vmem>>, %arg9: memref<1x32xf32, #tpu.memory_space<vmem>>, %arg10: memref<1x32xf32, #tpu.memory_space<vmem>>, %arg11: memref<1x32xf32, #tpu.memory_space<vmem>>, %arg12: memref<1x32xf32, #tpu.memory_space<vmem>>, %arg13: memref<1x1xf32, #tpu.memory_space<vmem>>, %arg14: memref<2x8xbf16, #tpu.memory_space<vmem>>, %arg15: memref<2x1xf32, #tpu.memory_space<vmem>>, %arg16: memref<8x40xbf16, #tpu.memory_space<vmem>>, %arg17: memref<8x48xbf16, #tpu.memory_space<vmem>>, %arg18: memref<8x32xbf16, #tpu.memory_space<vmem>>) attributes {dimension_semantics = [], scalar_prefetch = 0 : i64, scratch_operands = 3 : i64, tpu.core_type = #tpu.core_type<tc>} {
    %c0 = arith.constant 0 : index
    %c0_0 = arith.constant 0 : index
    %0 = vector.load %arg1[%c0, %c0_0] : memref<8x1xf32, #tpu.memory_space<vmem>>, vector<8x1xf32>
    %c0_1 = arith.constant 0 : index
    %c0_2 = arith.constant 0 : index
    %1 = vector.load %arg0[%c0_1, %c0_2] : memref<8x72xbf16, #tpu.memory_space<vmem>>, vector<8x24xbf16>
    %c0_3 = arith.constant 0 : index
    %c0_4 = arith.constant 0 : index
    %2 = vector.load %arg2[%c0_3, %c0_4] : memref<24x8xbf16, #tpu.memory_space<vmem>>, vector<24x8xbf16>
    %cst = arith.constant dense<0.000000e+00> : vector<8x8xf32>
    %3 = tpu.matmul %1, %2, %cst {dimension_numbers = #tpu.dot_dimension_numbers<[1], [0], [0], [1], [0, 0, 1, 1], [], []>} : vector<8x24xbf16>, vector<24x8xbf16>, vector<8x8xf32> -> vector<8x8xf32>
    %c0_5 = arith.constant 0 : index
    %c0_6 = arith.constant 0 : index
    %4 = vector.load %arg3[%c0_5, %c0_6] : memref<1x8xf32, #tpu.memory_space<vmem>>, vector<1x8xf32>
    %5 = vector.broadcast %4 : vector<1x8xf32> to vector<8x8xf32>
    %6 = arith.addf %3, %5 : vector<8x8xf32>
    %cst_7 = arith.constant 2.000000e-01 : f32
    %7 = vector.broadcast %cst_7 : f32 to vector<8x8xf32>
    %8 = arith.mulf %7, %6 : vector<8x8xf32>
    %9 = arith.maximumf %6, %8 : vector<8x8xf32>
    %10 = arith.truncf %9 : vector<8x8xf32> to vector<8x8xbf16>
    %c0_8 = arith.constant 0 : index
    %c8 = arith.constant 8 : index
    %11 = vector.load %arg16[%c0_8, %c8] : memref<8x40xbf16, #tpu.memory_space<vmem>>, vector<8x8xbf16>
    tpu.vector_store %arg16[%c0_8, %c8], %10 {strides = array<i32>} : memref<8x40xbf16, #tpu.memory_space<vmem>>, vector<8x8xbf16>,
    %c0_9 = arith.constant 0 : index
    %c16 = arith.constant 16 : index
    %12 = vector.load %arg0[%c0_9, %c16] : memref<8x72xbf16, #tpu.memory_space<vmem>>, vector<8x24xbf16>
    %c0_10 = arith.constant 0 : index
    %c0_11 = arith.constant 0 : index
    %13 = vector.load %arg2[%c0_10, %c0_11] : memref<24x8xbf16, #tpu.memory_space<vmem>>, vector<24x8xbf16>
    %cst_12 = arith.constant dense<0.000000e+00> : vector<8x8xf32>
    %14 = tpu.matmul %12, %13, %cst_12 {dimension_numbers = #tpu.dot_dimension_numbers<[1], [0], [0], [1], [0, 0, 1, 1], [], []>} : vector<8x24xbf16>, vector<24x8xbf16>, vector<8x8xf32> -> vector<8x8xf32>
    %c0_13 = arith.constant 0 : index
    %c0_14 = arith.constant 0 : index
    %15 = vector.load %arg3[%c0_13, %c0_14] : memref<1x8xf32, #tpu.memory_space<vmem>>, vector<1x8xf32>
    %16 = vector.broadcast %15 : vector<1x8xf32> to vector<8x8xf32>
    %17 = arith.addf %14, %16 : vector<8x8xf32>
    %cst_15 = arith.constant 2.000000e-01 : f32
    %18 = vector.broadcast %cst_15 : f32 to vector<8x8xf32>
    %19 = arith.mulf %18, %17 : vector<8x8xf32>
    %20 = arith.maximumf %17, %19 : vector<8x8xf32>
    %21 = arith.truncf %20 : vector<8x8xf32> to vector<8x8xbf16>
    %c0_16 = arith.constant 0 : index
    %c16_17 = arith.constant 16 : index
    %22 = vector.load %arg16[%c0_16, %c16_17] : memref<8x40xbf16, #tpu.memory_space<vmem>>, vector<8x8xbf16>
    tpu.vector_store %arg16[%c0_16, %c16_17], %21 {strides = array<i32>} : memref<8x40xbf16, #tpu.memory_space<vmem>>, vector<8x8xbf16>,
    %c0_18 = arith.constant 0 : index
    %c32 = arith.constant 32 : index
    %23 = vector.load %arg0[%c0_18, %c32] : memref<8x72xbf16, #tpu.memory_space<vmem>>, vector<8x24xbf16>
    %c0_19 = arith.constant 0 : index
    %c0_20 = arith.constant 0 : index
    %24 = vector.load %arg2[%c0_19, %c0_20] : memref<24x8xbf16, #tpu.memory_space<vmem>>, vector<24x8xbf16>
    %cst_21 = arith.constant dense<0.000000e+00> : vector<8x8xf32>
    %25 = tpu.matmul %23, %24, %cst_21 {dimension_numbers = #tpu.dot_dimension_numbers<[1], [0], [0], [1], [0, 0, 1, 1], [], []>} : vector<8x24xbf16>, vector<24x8xbf16>, vector<8x8xf32> -> vector<8x8xf32>
    %c0_22 = arith.constant 0 : index
    %c0_23 = arith.constant 0 : index
    %26 = vector.load %arg3[%c0_22, %c0_23] : memref<1x8xf32, #tpu.memory_space<vmem>>, vector<1x8xf32>
    %27 = vector.broadcast %26 : vector<1x8xf32> to vector<8x8xf32>
    %28 = arith.addf %25, %27 : vector<8x8xf32>
    %cst_24 = arith.constant 2.000000e-01 : f32
    %29 = vector.broadcast %cst_24 : f32 to vector<8x8xf32>
    %30 = arith.mulf %29, %28 : vector<8x8xf32>
    %31 = arith.maximumf %28, %30 : vector<8x8xf32>
    %32 = arith.truncf %31 : vector<8x8xf32> to vector<8x8xbf16>
    %c0_25 = arith.constant 0 : index
    %c24 = arith.constant 24 : index
    %33 = vector.load %arg16[%c0_25, %c24] : memref<8x40xbf16, #tpu.memory_space<vmem>>, vector<8x8xbf16>
    tpu.vector_store %arg16[%c0_25, %c24], %32 {strides = array<i32>} : memref<8x40xbf16, #tpu.memory_space<vmem>>, vector<8x8xbf16>,
    %c0_26 = arith.constant 0 : index
    %c48 = arith.constant 48 : index
    %34 = vector.load %arg0[%c0_26, %c48] : memref<8x72xbf16, #tpu.memory_space<vmem>>, vector<8x24xbf16>
    %c0_27 = arith.constant 0 : index
    %c0_28 = arith.constant 0 : index
    %35 = vector.load %arg2[%c0_27, %c0_28] : memref<24x8xbf16, #tpu.memory_space<vmem>>, vector<24x8xbf16>
    %cst_29 = arith.constant dense<0.000000e+00> : vector<8x8xf32>
    %36 = tpu.matmul %34, %35, %cst_29 {dimension_numbers = #tpu.dot_dimension_numbers<[1], [0], [0], [1], [0, 0, 1, 1], [], []>} : vector<8x24xbf16>, vector<24x8xbf16>, vector<8x8xf32> -> vector<8x8xf32>
    %c0_30 = arith.constant 0 : index
    %c0_31 = arith.constant 0 : index
    %37 = vector.load %arg3[%c0_30, %c0_31] : memref<1x8xf32, #tpu.memory_space<vmem>>, vector<1x8xf32>
    %38 = vector.broadcast %37 : vector<1x8xf32> to vector<8x8xf32>
    %39 = arith.addf %36, %38 : vector<8x8xf32>
    %cst_32 = arith.constant 2.000000e-01 : f32
    %40 = vector.broadcast %cst_32 : f32 to vector<8x8xf32>
    %41 = arith.mulf %40, %39 : vector<8x8xf32>
    %42 = arith.maximumf %39, %41 : vector<8x8xf32>
    %43 = arith.truncf %42 : vector<8x8xf32> to vector<8x8xbf16>
    %c0_33 = arith.constant 0 : index
    %c32_34 = arith.constant 32 : index
    %44 = vector.load %arg16[%c0_33, %c32_34] : memref<8x40xbf16, #tpu.memory_space<vmem>>, vector<8x8xbf16>
    tpu.vector_store %arg16[%c0_33, %c32_34], %43 {strides = array<i32>} : memref<8x40xbf16, #tpu.memory_space<vmem>>, vector<8x8xbf16>,
    %cst_35 = arith.constant 0.000000e+00 : f32
    %45 = vector.broadcast %cst_35 : f32 to vector<1x8xf32>
    %46 = vector.extract_strided_slice %42 {offsets = [0, 0], sizes = [7, 8], strides = [1, 1]} : vector<8x8xf32> to vector<7x8xf32>
    %47 = tpu.concatenate %45, %46 in 0 : vector<1x8xf32>, vector<7x8xf32> -> vector<8x8xf32>
    %48 = vector.broadcast %0 : vector<8x1xf32> to vector<8x8xf32>
    %49 = arith.mulf %47, %48 : vector<8x8xf32>
    %50 = arith.truncf %49 : vector<8x8xf32> to vector<8x8xbf16>
    %c0_36 = arith.constant 0 : index
    %c0_37 = arith.constant 0 : index
    %51 = vector.load %arg16[%c0_36, %c0_37] : memref<8x40xbf16, #tpu.memory_space<vmem>>, vector<8x8xbf16>
    tpu.vector_store %arg16[%c0_36, %c0_37], %50 {strides = array<i32>} : memref<8x40xbf16, #tpu.memory_space<vmem>>, vector<8x8xbf16>,
    %c0_38 = arith.constant 0 : index
    %c0_39 = arith.constant 0 : index
    %52 = vector.load %arg16[%c0_38, %c0_39] : memref<8x40xbf16, #tpu.memory_space<vmem>>, vector<8x24xbf16>
    %c0_40 = arith.constant 0 : index
    %c0_41 = arith.constant 0 : index
    %53 = vector.load %arg4[%c0_40, %c0_41] : memref<24x16xbf16, #tpu.memory_space<vmem>>, vector<24x16xbf16>
    %cst_42 = arith.constant dense<0.000000e+00> : vector<8x16xf32>
    %54 = tpu.matmul %52, %53, %cst_42 {dimension_numbers = #tpu.dot_dimension_numbers<[1], [0], [0], [1], [0, 0, 1, 1], [], []>} : vector<8x24xbf16>, vector<24x16xbf16>, vector<8x16xf32> -> vector<8x16xf32>
    %c0_43 = arith.constant 0 : index
    %c0_44 = arith.constant 0 : index
    %55 = vector.load %arg5[%c0_43, %c0_44] : memref<1x16xf32, #tpu.memory_space<vmem>>, vector<1x16xf32>
    %56 = vector.broadcast %55 : vector<1x16xf32> to vector<8x16xf32>
    %57 = arith.addf %54, %56 : vector<8x16xf32>
    %c0_45 = arith.constant 0 : index
    %c16_46 = arith.constant 16 : index
    %58 = vector.load %arg16[%c0_45, %c16_46] : memref<8x40xbf16, #tpu.memory_space<vmem>>, vector<8x24xbf16>
    %c0_47 = arith.constant 0 : index
    %c0_48 = arith.constant 0 : index
    %59 = vector.load %arg4[%c0_47, %c0_48] : memref<24x16xbf16, #tpu.memory_space<vmem>>, vector<24x16xbf16>
    %cst_49 = arith.constant dense<0.000000e+00> : vector<8x16xf32>
    %60 = tpu.matmul %58, %59, %cst_49 {dimension_numbers = #tpu.dot_dimension_numbers<[1], [0], [0], [1], [0, 0, 1, 1], [], []>} : vector<8x24xbf16>, vector<24x16xbf16>, vector<8x16xf32> -> vector<8x16xf32>
    %c0_50 = arith.constant 0 : index
    %c0_51 = arith.constant 0 : index
    %61 = vector.load %arg5[%c0_50, %c0_51] : memref<1x16xf32, #tpu.memory_space<vmem>>, vector<1x16xf32>
    %62 = vector.broadcast %61 : vector<1x16xf32> to vector<8x16xf32>
    %63 = arith.addf %60, %62 : vector<8x16xf32>
    %cst_52 = arith.constant 1.000000e+00 : f32
    %64 = vector.broadcast %cst_52 : f32 to vector<1x8xf32>
    %cst_53 = arith.constant dense<0.000000e+00> : vector<1x16xf32>
    %65 = tpu.matmul %64, %57, %cst_53 {dimension_numbers = #tpu.dot_dimension_numbers<[1], [0], [0], [1], [0, 0, 1, 1], [], []>} : vector<1x8xf32>, vector<8x16xf32>, vector<1x16xf32> -> vector<1x16xf32>
    %cst_54 = arith.constant 8.000000e+00 : f32
    %66 = vector.broadcast %cst_54 : f32 to vector<1x16xf32>
    %67 = arith.divf %65, %66 : vector<1x16xf32>
    %cst_55 = arith.constant 1.000000e+00 : f32
    %68 = vector.broadcast %cst_55 : f32 to vector<1x8xf32>
    %cst_56 = arith.constant dense<0.000000e+00> : vector<1x16xf32>
    %69 = tpu.matmul %68, %63, %cst_56 {dimension_numbers = #tpu.dot_dimension_numbers<[1], [0], [0], [1], [0, 0, 1, 1], [], []>} : vector<1x8xf32>, vector<8x16xf32>, vector<1x16xf32> -> vector<1x16xf32>
    %cst_57 = arith.constant 8.000000e+00 : f32
    %70 = vector.broadcast %cst_57 : f32 to vector<1x16xf32>
    %71 = arith.divf %69, %70 : vector<1x16xf32>
    %72 = arith.addf %67, %71 : vector<1x16xf32>
    %cst_58 = arith.constant 5.000000e-01 : f32
    %73 = vector.broadcast %cst_58 : f32 to vector<1x16xf32>
    %74 = arith.mulf %73, %72 : vector<1x16xf32>
    %75 = arith.mulf %57, %57 : vector<8x16xf32>
    %cst_59 = arith.constant 1.000000e+00 : f32
    %76 = vector.broadcast %cst_59 : f32 to vector<1x8xf32>
    %cst_60 = arith.constant dense<0.000000e+00> : vector<1x16xf32>
    %77 = tpu.matmul %76, %75, %cst_60 {dimension_numbers = #tpu.dot_dimension_numbers<[1], [0], [0], [1], [0, 0, 1, 1], [], []>} : vector<1x8xf32>, vector<8x16xf32>, vector<1x16xf32> -> vector<1x16xf32>
    %cst_61 = arith.constant 8.000000e+00 : f32
    %78 = vector.broadcast %cst_61 : f32 to vector<1x16xf32>
    %79 = arith.divf %77, %78 : vector<1x16xf32>
    %80 = arith.mulf %63, %63 : vector<8x16xf32>
    %cst_62 = arith.constant 1.000000e+00 : f32
    %81 = vector.broadcast %cst_62 : f32 to vector<1x8xf32>
    %cst_63 = arith.constant dense<0.000000e+00> : vector<1x16xf32>
    %82 = tpu.matmul %81, %80, %cst_63 {dimension_numbers = #tpu.dot_dimension_numbers<[1], [0], [0], [1], [0, 0, 1, 1], [], []>} : vector<1x8xf32>, vector<8x16xf32>, vector<1x16xf32> -> vector<1x16xf32>
    %cst_64 = arith.constant 8.000000e+00 : f32
    %83 = vector.broadcast %cst_64 : f32 to vector<1x16xf32>
    %84 = arith.divf %82, %83 : vector<1x16xf32>
    %85 = arith.addf %79, %84 : vector<1x16xf32>
    %cst_65 = arith.constant 5.000000e-01 : f32
    %86 = vector.broadcast %cst_65 : f32 to vector<1x16xf32>
    %87 = arith.mulf %86, %85 : vector<1x16xf32>
    %88 = arith.mulf %74, %74 : vector<1x16xf32>
    %89 = arith.subf %87, %88 : vector<1x16xf32>
    %cst_66 = arith.constant 9.99999974E-6 : f32
    %90 = vector.broadcast %cst_66 : f32 to vector<1x16xf32>
    %91 = arith.addf %89, %90 : vector<1x16xf32>
    %92 = math.rsqrt %91 : vector<1x16xf32>
    %c0_67 = arith.constant 0 : index
    %c0_68 = arith.constant 0 : index
    %93 = vector.load %arg6[%c0_67, %c0_68] : memref<1x16xf32, #tpu.memory_space<vmem>>, vector<1x16xf32>
    %94 = arith.mulf %92, %93 : vector<1x16xf32>
    %c0_69 = arith.constant 0 : index
    %c0_70 = arith.constant 0 : index
    %95 = vector.load %arg7[%c0_69, %c0_70] : memref<1x16xf32, #tpu.memory_space<vmem>>, vector<1x16xf32>
    %96 = arith.mulf %74, %94 : vector<1x16xf32>
    %97 = arith.subf %95, %96 : vector<1x16xf32>
    %98 = vector.broadcast %94 : vector<1x16xf32> to vector<8x16xf32>
    %99 = arith.mulf %57, %98 : vector<8x16xf32>
    %100 = vector.broadcast %97 : vector<1x16xf32> to vector<8x16xf32>
    %101 = arith.addf %99, %100 : vector<8x16xf32>
    %cst_71 = arith.constant 2.000000e-01 : f32
    %102 = vector.broadcast %cst_71 : f32 to vector<8x16xf32>
    %103 = arith.mulf %102, %101 : vector<8x16xf32>
    %104 = arith.maximumf %101, %103 : vector<8x16xf32>
    %105 = vector.broadcast %94 : vector<1x16xf32> to vector<8x16xf32>
    %106 = arith.mulf %63, %105 : vector<8x16xf32>
    %107 = vector.broadcast %97 : vector<1x16xf32> to vector<8x16xf32>
    %108 = arith.addf %106, %107 : vector<8x16xf32>
    %cst_72 = arith.constant 2.000000e-01 : f32
    %109 = vector.broadcast %cst_72 : f32 to vector<8x16xf32>
    %110 = arith.mulf %109, %108 : vector<8x16xf32>
    %111 = arith.maximumf %108, %110 : vector<8x16xf32>
    %112 = arith.truncf %104 : vector<8x16xf32> to vector<8x16xbf16>
    %c0_73 = arith.constant 0 : index
    %c16_74 = arith.constant 16 : index
    %113 = vector.load %arg17[%c0_73, %c16_74] : memref<8x48xbf16, #tpu.memory_space<vmem>>, vector<8x16xbf16>
    tpu.vector_store %arg17[%c0_73, %c16_74], %112 {strides = array<i32>} : memref<8x48xbf16, #tpu.memory_space<vmem>>, vector<8x16xbf16>,
    %114 = arith.truncf %111 : vector<8x16xf32> to vector<8x16xbf16>
    %c0_75 = arith.constant 0 : index
    %c32_76 = arith.constant 32 : index
    %115 = vector.load %arg17[%c0_75, %c32_76] : memref<8x48xbf16, #tpu.memory_space<vmem>>, vector<8x16xbf16>
    tpu.vector_store %arg17[%c0_75, %c32_76], %114 {strides = array<i32>} : memref<8x48xbf16, #tpu.memory_space<vmem>>, vector<8x16xbf16>,
    %cst_77 = arith.constant 0.000000e+00 : f32
    %116 = vector.broadcast %cst_77 : f32 to vector<1x16xf32>
    %117 = vector.extract_strided_slice %111 {offsets = [0, 0], sizes = [7, 16], strides = [1, 1]} : vector<8x16xf32> to vector<7x16xf32>
    %118 = tpu.concatenate %116, %117 in 0 : vector<1x16xf32>, vector<7x16xf32> -> vector<8x16xf32>
    %119 = vector.broadcast %0 : vector<8x1xf32> to vector<8x16xf32>
    %120 = arith.mulf %118, %119 : vector<8x16xf32>
    %121 = arith.truncf %120 : vector<8x16xf32> to vector<8x16xbf16>
    %c0_78 = arith.constant 0 : index
    %c0_79 = arith.constant 0 : index
    %122 = vector.load %arg17[%c0_78, %c0_79] : memref<8x48xbf16, #tpu.memory_space<vmem>>, vector<8x16xbf16>
    tpu.vector_store %arg17[%c0_78, %c0_79], %121 {strides = array<i32>} : memref<8x48xbf16, #tpu.memory_space<vmem>>, vector<8x16xbf16>,
    %c0_80 = arith.constant 0 : index
    %c0_81 = arith.constant 0 : index
    %123 = vector.load %arg17[%c0_80, %c0_81] : memref<8x48xbf16, #tpu.memory_space<vmem>>, vector<8x48xbf16>
    %c0_82 = arith.constant 0 : index
    %c0_83 = arith.constant 0 : index
    %124 = vector.load %arg8[%c0_82, %c0_83] : memref<48x32xbf16, #tpu.memory_space<vmem>>, vector<48x32xbf16>
    %cst_84 = arith.constant dense<0.000000e+00> : vector<8x32xf32>
    %125 = tpu.matmul %123, %124, %cst_84 {dimension_numbers = #tpu.dot_dimension_numbers<[1], [0], [0], [1], [0, 0, 1, 1], [], []>} : vector<8x48xbf16>, vector<48x32xbf16>, vector<8x32xf32> -> vector<8x32xf32>
    %c0_85 = arith.constant 0 : index
    %c0_86 = arith.constant 0 : index
    %126 = vector.load %arg9[%c0_85, %c0_86] : memref<1x32xf32, #tpu.memory_space<vmem>>, vector<1x32xf32>
    %127 = vector.broadcast %126 : vector<1x32xf32> to vector<8x32xf32>
    %128 = arith.addf %125, %127 : vector<8x32xf32>
    %cst_87 = arith.constant 1.000000e+00 : f32
    %129 = vector.broadcast %cst_87 : f32 to vector<1x8xf32>
    %cst_88 = arith.constant dense<0.000000e+00> : vector<1x32xf32>
    %130 = tpu.matmul %129, %128, %cst_88 {dimension_numbers = #tpu.dot_dimension_numbers<[1], [0], [0], [1], [0, 0, 1, 1], [], []>} : vector<1x8xf32>, vector<8x32xf32>, vector<1x32xf32> -> vector<1x32xf32>
    %cst_89 = arith.constant 8.000000e+00 : f32
    %131 = vector.broadcast %cst_89 : f32 to vector<1x32xf32>
    %132 = arith.divf %130, %131 : vector<1x32xf32>
    %133 = arith.mulf %128, %128 : vector<8x32xf32>
    %cst_90 = arith.constant 1.000000e+00 : f32
    %134 = vector.broadcast %cst_90 : f32 to vector<1x8xf32>
    %cst_91 = arith.constant dense<0.000000e+00> : vector<1x32xf32>
    %135 = tpu.matmul %134, %133, %cst_91 {dimension_numbers = #tpu.dot_dimension_numbers<[1], [0], [0], [1], [0, 0, 1, 1], [], []>} : vector<1x8xf32>, vector<8x32xf32>, vector<1x32xf32> -> vector<1x32xf32>
    %cst_92 = arith.constant 8.000000e+00 : f32
    %136 = vector.broadcast %cst_92 : f32 to vector<1x32xf32>
    %137 = arith.divf %135, %136 : vector<1x32xf32>
    %138 = arith.mulf %132, %132 : vector<1x32xf32>
    %139 = arith.subf %137, %138 : vector<1x32xf32>
    %cst_93 = arith.constant 9.99999974E-6 : f32
    %140 = vector.broadcast %cst_93 : f32 to vector<1x32xf32>
    %141 = arith.addf %139, %140 : vector<1x32xf32>
    %142 = math.rsqrt %141 : vector<1x32xf32>
    %c0_94 = arith.constant 0 : index
    %c0_95 = arith.constant 0 : index
    %143 = vector.load %arg10[%c0_94, %c0_95] : memref<1x32xf32, #tpu.memory_space<vmem>>, vector<1x32xf32>
    %144 = arith.mulf %142, %143 : vector<1x32xf32>
    %c0_96 = arith.constant 0 : index
    %c0_97 = arith.constant 0 : index
    %145 = vector.load %arg11[%c0_96, %c0_97] : memref<1x32xf32, #tpu.memory_space<vmem>>, vector<1x32xf32>
    %146 = arith.mulf %132, %144 : vector<1x32xf32>
    %147 = arith.subf %145, %146 : vector<1x32xf32>
    %148 = vector.broadcast %144 : vector<1x32xf32> to vector<8x32xf32>
    %149 = arith.mulf %128, %148 : vector<8x32xf32>
    %150 = vector.broadcast %147 : vector<1x32xf32> to vector<8x32xf32>
    %151 = arith.addf %149, %150 : vector<8x32xf32>
    %cst_98 = arith.constant 2.000000e-01 : f32
    %152 = vector.broadcast %cst_98 : f32 to vector<8x32xf32>
    %153 = arith.mulf %152, %151 : vector<8x32xf32>
    %154 = arith.maximumf %151, %153 : vector<8x32xf32>
    %155 = arith.truncf %154 : vector<8x32xf32> to vector<8x32xbf16>
    %c0_99 = arith.constant 0 : index
    %c0_100 = arith.constant 0 : index
    %156 = vector.load %arg18[%c0_99, %c0_100] : memref<8x32xbf16, #tpu.memory_space<vmem>>, vector<8x32xbf16>
    tpu.vector_store %arg18[%c0_99, %c0_100], %155 {strides = array<i32>} : memref<8x32xbf16, #tpu.memory_space<vmem>>, vector<8x32xbf16>,
    %c0_101 = arith.constant 0 : index
    %c0_102 = arith.constant 0 : index
    %157 = vector.load %arg14[%c0_101, %c0_102] : memref<2x8xbf16, #tpu.memory_space<vmem>>, vector<2x8xbf16>
    %c0_103 = arith.constant 0 : index
    %c0_104 = arith.constant 0 : index
    %158 = vector.load %arg18[%c0_103, %c0_104] : memref<8x32xbf16, #tpu.memory_space<vmem>>, vector<8x32xbf16>
    %cst_105 = arith.constant dense<0.000000e+00> : vector<2x32xf32>
    %159 = tpu.matmul %157, %158, %cst_105 {dimension_numbers = #tpu.dot_dimension_numbers<[1], [0], [0], [1], [0, 0, 1, 1], [], []>} : vector<2x8xbf16>, vector<8x32xbf16>, vector<2x32xf32> -> vector<2x32xf32>
    %c0_106 = arith.constant 0 : index
    %c0_107 = arith.constant 0 : index
    %160 = vector.load %arg12[%c0_106, %c0_107] : memref<1x32xf32, #tpu.memory_space<vmem>>, vector<1x32xf32>
    %161 = vector.broadcast %160 : vector<1x32xf32> to vector<2x32xf32>
    %162 = arith.mulf %159, %161 : vector<2x32xf32>
    %cst_108 = arith.constant dense<0.000000e+00> : vector<2xf32>
    %163 = vector.multi_reduction <add>, %162, %cst_108 [1] : vector<2x32xf32> to vector<2xf32>
    %164 = vector.shape_cast %163 : vector<2xf32> to vector<2x1xf32>
    %c0_109 = arith.constant 0 : index
    %c0_110 = arith.constant 0 : index
    %165 = vector.load %arg13[%c0_109, %c0_110] : memref<1x1xf32, #tpu.memory_space<vmem>>, vector<1x1xf32>
    %166 = vector.broadcast %165 : vector<1x1xf32> to vector<2x1xf32>
    %167 = arith.addf %164, %166 : vector<2x1xf32>
    %c0_111 = arith.constant 0 : index
    %c0_112 = arith.constant 0 : index
    %168 = vector.load %arg15[%c0_111, %c0_112] : memref<2x1xf32, #tpu.memory_space<vmem>>, vector<2x1xf32>
    tpu.vector_store %arg15[%c0_111, %c0_112], %167 {strides = array<i32>} : memref<2x1xf32, #tpu.memory_space<vmem>>, vector<2x1xf32>,
    return
  }
}

</mosaic_0001>

<bundles_post_ra>
// kernel: tpu_custom_call.1
= control target key start
LH: loop header
LB: loop body
LE: loop exit
PB: predicated region body
PF: predicated region fallthrough
CT: control target
= control target key end

     0   :  { %vm78_vm0 = vcmask 1043456   ;;  %v1389_v1 = vmov 0.0   ;;  %vm1390_vm1 = vmmov 0   ;;  %s1391_s24 = smov 112   ;;  %s1392_s27 = smov 80   ;;  %v1393_v9 = vmov 0   ;;  %s1666_s0 = inlined_call_operand.vmem [shape: bf16[8,72], index: 0, kind: input, shape index: {}]   ;;  %s1667_s2 = inlined_call_operand.vmem [shape: bf16[24,8], index: 2, kind: input, shape index: {}]   ;;  %s1668_s1 = inlined_call_operand.vmem [shape: f32[8,1], index: 1, kind: input, shape index: {}]   ;;  %s1669_s3 = inlined_call_operand.vmem [shape: f32[1,8], index: 3, kind: input, shape index: {}]   ;;  %s1670_s4 = inlined_call_operand.vmem [shape: bf16[24,16], index: 4, kind: input, shape index: {}]   ;;  %s1671_s5 = inlined_call_operand.vmem [shape: f32[1,16], index: 5, kind: input, shape index: {}]   ;;  %s1672_s8 = inlined_call_operand.vmem [shape: bf16[48,32], index: 8, kind: input, shape index: {}]   ;;  %s1673_s6 = inlined_call_operand.vmem [shape: f32[1,16], index: 6, kind: input, shape index: {}]   ;;  %s1674_s7 = inlined_call_operand.vmem [shape: f32[1,16], index: 7, kind: input, shape index: {}]   ;;  %s1675_s9 = inlined_call_operand.vmem [shape: f32[1,32], index: 9, kind: input, shape index: {}]   ;;  %s1676_s10 = inlined_call_operand.vmem [shape: f32[1,32], index: 10, kind: input, shape index: {}]   ;;  %s1677_s11 = inlined_call_operand.vmem [shape: f32[1,32], index: 11, kind: input, shape index: {}]   ;;  %s1678_s14 = inlined_call_operand.vmem [shape: bf16[2,8], index: 14, kind: input, shape index: {}]   ;;  %s1679_s13 = inlined_call_operand.<no memory space> [shape: f32[1,1], index: 13, kind: input, shape index: {}]   ;;  %s1680_s12 = inlined_call_operand.vmem [shape: f32[1,32], index: 12, kind: input, shape index: {}]   ;;  %s1681_s15 = inlined_call_operand.vmem [shape: f32[2,1], index: 15, kind: output, shape index: {}]  }
   0x1   :  { %v1368_v0 = vld [vmem:[%s1666_s0] ss:$0 sps:$4 sm:$0xff]   ;;  %1261 = vmatprep.subr.bf16.mxu0 %v1389_v1  ;;  %1269 = vmatprep.subr.bf16.mxu1 %v1389_v1  ;;  %v1372_v5 = vld [vmem:[%s1667_s2 + $0x8] ss:$0 sps:$4 sm:$0xff]   ;;  %s1394_s19 = smov 96   ;;  %vm74_vm2 = vcmask 195584  }
   0x2   :  { %v1369_v2 = vld [vmem:[%s1666_s0] ss:$0 sps:$4 sm:$0xff]   ;;  %1265 = vmatprep.mubr.msk.bf16.mxu0 %vm1390_vm1, %v1389_v1  ;;  %1273 = vmatprep.mubr.msk.bf16.mxu1 %vm1390_vm1, %v1389_v1  ;;  %v80_v7 = vsel %vm78_vm0, %v1372_v5, 0  ;;  %v1374_v8 = vld [vmem:[%s1667_s2 + $0x8] ss:$0 sps:$4 sm:$0xff]   ;;  %s1395_s17 = smov 8  }
   0x3   :  { %v1370_v3 = vld [vmem:[%s1666_s0] ss:$0 sps:$4 sm:$0xff]   ;;  %147 = vrot.lane.b32.xlu0 %v1368_v0, %s1391_s24  ;;  %1366 = vset.pattern.permute.xlu1 %v1393_v9  ;;  %v162_v11 = vsel %vm78_vm0, %v1374_v8, 0  ;;  %v1376_v13 = vld [vmem:[%s1667_s2 + $0x8] ss:$0 sps:$4 sm:$0xff]   ;;  %s1396_s21 = smov 16  }
   0x4   :  { %v1371_v4 = vld [vmem:[%s1667_s2] sm:$0xff]   ;;  %311 = vrot.lane.b32.xlu1 %v1370_v3, %s1392_s27  ;;  %1367 = vset.pattern.permute.xlu0 %v1393_v9  ;;  %v244_v15 = vsel %vm78_vm0, %v1376_v13, 0  ;;  %v1378_v17 = vld [vmem:[%s1667_s2 + $0x8] ss:$0 sps:$4 sm:$0xff]   ;;  %vm131_vm3 = vcmask 126016   ;;  %s1398_s22 = smov 32  }
   0x5   :  { %1262 = vmatpush3.bf16.msra.mxu0 %v1371_v4  ;;  %v1373_v6 = vld [vmem:[%s1667_s2] sm:$0xff]   ;;  %v326_v19 = vsel %vm78_vm0, %v1378_v17, 0  ;;  %v1380_v42 = vld [vmem:[%s1670_s4 + $0x8] ss:$0 sps:$4 sm:$0xff]   ;;  %vm382_vm4 = vcmask 1040384   ;;  %vm213_vm5 = vcmask 191616  }
   0x6   :  { %1263 = vmatprep.subr.bf16.mxu0 %v1389_v1  ;;  %1270 = vmatpush3.bf16.msra.mxu1 %v1373_v6  ;;  %v54_v10 = vld [vmem:[%s1666_s0] sm:$0xf]  ;;  %v417_v47 = vsel %vm78_vm0, %v1380_v42, 0  ;;  %vm295_vm6 = vcmask 257216   ;;  %vm377_vm7 = vcmask 322816   ;;  %vm391_vm8 = vcmask 60416  }
   0x7   :  { %229 = vrot.lane.b32.xlu0 %v1369_v2, %s1394_s19  ;;  %1271 = vmatprep.subr.bf16.mxu1 %v1389_v1  ;;  %v1375_v12 = vld [vmem:[%s1667_s2] sm:$0xff]   ;;  %vm507_vm9 = vcmask 64512   ;;  %vm836_vm10 = vcmask 257152   ;;  %vm845_vm11 = vcmask 388352   ;;  %vm853_vm12 = vcmask 125952  }
   0x8   :  { %v53_v14 = vld [vmem:[%s1668_s1] sm:$0xff]  ;;  %vm887_vm13 = vcmask 392192   ;;  %vm1098_vm14 = vcmask 257024   ;;  %vm1156_vm15 = vcmask 254976  }
   0x9   :  { %1264 = vmatpush3.bf16.msra.mxu0 %v80_v7  ;;  %386 = vperm.xlu1 %1366, %v53_v14   ;;  %v1377_v16 = vld [vmem:[%s1667_s2] sm:$0xff]   ;;  %v1399_v14 = vmov 1.0  }
   0xa   :  { %1277 = vmatprep.subr.bf16.mxu0 %v1389_v1  ;;  %1272 = vmatpush3.bf16.msra.mxu1 %v162_v11  ;;  %v1174_v22 = vld [vmem:[%s1669_s3] ss:$0 sm:$0xff] }
   0xb   :  { %1285 = vmatprep.subr.bf16.mxu1 %v1389_v1  ;;  %v1379_v38 = vld [vmem:[%s1670_s4] sm:$0xff]   ;;  %s1397_s4 = smov 24  }
   0xc   :  { %1266 = vmatmul.mubr.msk.bf16.vlgmr.msra.gmra.mrb[0].mxu0 %vm74_vm2, %v54_v10  ;;  %v1197_v7 = vld [vmem:[%s1671_s5] ss:$0 sm:$0xff] }
   0xd   :  { %1278 = vmatpush3.bf16.msra.mxu0 %v1375_v12  ;;  %1281 = vmatprep.mubr.msk.bf16.mxu0 %vm1390_vm1, %v1389_v1 }
   0xe   :  { %1279 = vmatprep.subr.bf16.mxu0 %v1389_v1 }
  0x11   :  { %1280 = vmatpush3.bf16.msra.mxu0 %v244_v15 }
  0x12   :  { %1293 = vmatprep.subr.bf16.mxu0 %v1389_v1 }
  0x75   :  { %v148_v18 = vpop.permute.xlu0 %147 }
  0x76   :  { %1274 = vmatmul.mubr.msk.bf16.vlgmr.msra.gmra.mrb[0].mxu1 %vm74_vm2, %v148_v18  ;;  %v312_v21 = vpop.permute.xlu1 %311 }
  0x77   :  { %1286 = vmatpush3.bf16.msra.mxu1 %v1377_v16  ;;  %1289 = vmatprep.mubr.msk.bf16.mxu1 %vm1390_vm1, %v1389_v1 }
  0x78   :  { %1287 = vmatprep.subr.bf16.mxu1 %v1389_v1 }
  0x79   :  { %v230_v20 = vpop.permute.xlu0 %229 }
  0x7a   :  { %1282 = vmatmul.mubr.msk.bf16.vlgmr.msra.gmra.mrb[4].mxu0 %vm74_vm2, %v230_v20 }
  0x7b   :  { %1288 = vmatpush3.bf16.msra.mxu1 %v326_v19  ;;  %1297 = vmatprep.mubr.msk.bf16.mxu0 %vm1390_vm1, %v1389_v1 }
  0x7c   :  { %1301 = vmatprep.subr.bf16.mxu1 %v1389_v1  ;;  %1294 = vmatpush3.bf16.msra.mxu0 %v1379_v38 }
  0x7d   :  { %1295 = vmatprep.subr.bf16.mxu0 %v1389_v1 }
  0x7e   :  { %1290 = vmatmul.mubr.msk.bf16.vlgmr.msra.gmra.mrb[4].mxu1 %vm74_vm2, %v312_v21 }
  0x7f   :  { %1305 = vmatprep.mubr.msk.bf16.mxu1 %vm1390_vm1, %v1389_v1  ;;  %1302 = vmatpush3.bf16.msra.mxu1 %v1379_v38 }
  0x80   :  { %1303 = vmatprep.subr.bf16.mxu1 %v1389_v1  ;;  %1296 = vmatpush3.bf16.msra.mxu0 %v417_v47 }
  0x81   :  { %1309 = vmatprep.subr.mxu0 %v1389_v1 }
  0x83   :  { %1304 = vmatpush3.bf16.msra.mxu1 %v417_v47  ;;  %v808_v47 = vld [vmem:[%s1674_s7] sm:$0x1] }
  0x84   :  { %1314 = vmatprep.subr.mxu1 %v1389_v1 }
  0x88   :  { %v1566_v59 = vpop.permute.xlu1 %386 }
  0xdf   :  { %v116_v23 = vpop.f32.mrb[0].mxu0 }
  0xe0   :  { %v117_v24 = vadd.f32 %v1174_v22, %v116_v23  ;;  %v1267_v25 = vpop.f32.mrb[1].mxu0 }
  0xe1   :  { %v119_v26 = vpop.f32.mrb[2].mxu0  ;;  %v1382_v25 = vld [vmem:[%s1672_s8] sm:$0xff]  }
  0xe2   :  { %v122_v27 = vmul.f32 0.2, %v117_v24  ;;  %v1268_v28 = vpop.f32.mrb[3].mxu0 }
  0xe4   :  { %v123_v29 = vmax.f32 %v117_v24, %v122_v27 }
  0xe6   :  { %v1219_v30 = vpack.c.bf16 %v123_v29, %v123_v29 }
  0xe8   :  { %128 = vrot.lane.b32.xlu0 %v1219_v30, %s1395_s17 }
 0x149   :  { %v198_v31 = vpop.f32.mrb[0].mxu1 }
 0x14a   :  { %v199_v32 = vadd.f32 %v1174_v22, %v198_v31  ;;  %v1275_v33 = vpop.f32.mrb[1].mxu1 }
 0x14b   :  { %v201_v34 = vpop.f32.mrb[2].mxu1 }
 0x14c   :  { %v204_v35 = vmul.f32 0.2, %v199_v32  ;;  %v1276_v36 = vpop.f32.mrb[3].mxu1 }
 0x14d   :  { %v280_v37 = vpop.f32.mrb[4].mxu0 }
 0x14e   :  { %v205_v39 = vmax.f32 %v199_v32, %v204_v35  ;;  %v281_v40 = vadd.f32 %v1174_v22, %v280_v37  ;;  %v1283_v41 = vpop.f32.mrb[5].mxu0 }
 0x14f   :  { %v283_v43 = vpop.f32.mrb[6].mxu0  ;;  %v811_v41 = vlaneseq }
 0x150   :  { %v1220_v44 = vpack.c.bf16 %v205_v39, %v205_v39  ;;  %v286_v45 = vmul.f32 0.2, %v281_v40  ;;  %v1284_v46 = vpop.f32.mrb[7].mxu0  ;;  %v806_v43 = vld [vmem:[%s1673_s6] sm:$0x1] }
 0x151   :  { %v362_v48 = vpop.f32.mrb[4].mxu1  ;;  %v812_v42 = vshrl.u32 %v811_v41, 7 }
 0x152   :  { %v287_v49 = vmax.f32 %v281_v40, %v286_v45  ;;  %v363_v50 = vadd.f32 %v1174_v22, %v362_v48  ;;  %210 = vrot.lane.b32.xlu1 %v1220_v44, %s1396_s21  ;;  %v1291_v51 = vpop.f32.mrb[5].mxu1 }
 0x153   :  { %v365_v52 = vpop.f32.mrb[6].mxu1  ;;  %v1612_v44 = vsub.s32 0, %v812_v42  ;;  %v1383_v51 = vld [vmem:[%s1672_s8 + $0x8] sm:$0xff]  }
 0x154   :  { %v1221_v53 = vpack.c.bf16 %v287_v49, %v287_v49  ;;  %v368_v54 = vmul.f32 0.2, %v363_v50  ;;  %v1292_v55 = vpop.f32.mrb[7].mxu1 }
 0x155   :  { %v1384_v55 = vld [vmem:[%s1672_s8 + $0x10] sm:$0xff]  }
 0x156   :  { %v369_v56 = vmax.f32 %v363_v50, %v368_v54  ;;  %292 = vrot.lane.b32.xlu0 %v1221_v53, %s1397_s4 }
 0x158   :  { %v1222_v57 = vpack.c.bf16 %v369_v56, %v369_v56  ;;  %v380_v60 = vrot.slane %v369_v56, 7 }
 0x15a   :  { %374 = vrot.lane.b32.xlu1 %v1222_v57, %s1398_s22  ;;  %v129_v58 = vpop.permute.xlu0 %128  ;;  %v383_v62 = vsel %vm382_vm4, 0.0, %v380_v60 }
 0x15b   :  { %132 = vst.msk [vmem:[#allocation2] sm:$0xf] %vm131_vm3, %v129_v58  ;;  %v389_v63 = vmul.f32 %v1566_v59, %v383_v62 }
 0x15d   :  { %v390_v2 = vpack.c.bf16 %v389_v63, %v389_v63 }
 0x1c4   :  { %v211_v61 = vpop.permute.xlu1 %210 }
 0x1c5   :  { %214 = vst.msk [vmem:[#allocation2] sm:$0xf] %vm213_vm5, %v211_v61 }
 0x1c8   :  { %v293_v0 = vpop.permute.xlu0 %292 }
 0x1c9   :  { %296 = vst.msk [vmem:[#allocation2] sm:$0xf] %vm295_vm6, %v293_v0 }
 0x1cc   :  { %v375_v3 = vpop.permute.xlu1 %374 }
 0x1cd   :  { %378 = vst.msk [vmem:[#allocation2] sm:$0xf] %vm377_vm7, %v375_v3 }
 0x1ce   :  { %392 = vst.msk [vmem:[#allocation2] sm:$0xf] %vm391_vm8, %v390_v2 }
 0x1d5   :  { %v393_v4 = vld [vmem:[#allocation2] sm:$0xf] }
 0x1d6   :  { %1298 = vmatmul.mubr.msk.bf16.vlgmr.msra.gmra.mrb[8].mxu0 %vm74_vm2, %v393_v4  ;;  %v1201_v5 = vcombine.low %v393_v4, %v393_v4 }
 0x1d7   :  { %1311 = vmatprep.mubr.msk.f32.mxu0 %vm1390_vm1, %v1389_v1 }
 0x1d8   :  { %462 = vrot.lane.b32.xlu0 %v1201_v5, %s1391_s24 }
 0x24a   :  { %v463_v6 = vpop.permute.xlu0 %462 }
 0x24b   :  { %1306 = vmatmul.mubr.msk.bf16.vlgmr.msra.gmra.mrb[8].mxu1 %vm74_vm2, %v463_v6 }
 0x24c   :  { %1316 = vmatprep.mubr.msk.f32.mxu1 %vm1390_vm1, %v1389_v1 }
 0x2a9   :  { %v453_v8 = vpop.f32.mrb[8].mxu0 }
 0x2aa   :  { %v1580_v9 = vadd.f32 %v1197_v7, %v453_v8  ;;  %v1299_v10 = vpop.f32.mrb[9].mxu0 }
 0x2ab   :  { %v456_v11 = vpop.f32.mrb[10].mxu0 }
 0x2ac   :  { %v656_v12 = vmul.f32 %v1580_v9, %v1580_v9  ;;  %v1300_v13 = vpop.f32.mrb[11].mxu0  ;;  %1310 = vmatpush3.msra.mxu0 %v1580_v9 }
 0x2ad   :  { %1319 = vmatprep.subr.mxu0 %v1389_v1  ;;  %1312 = vmatmul.mubr.msk.f32.vlgmr.msra.gmra.mrb[12].mxu0 %vm507_vm9, %v1399_v14 }
 0x2ae   :  { %1320 = vmatpush3.msra.mxu0 %v656_v12  ;;  %1321 = vmatprep.mubr.msk.f32.mxu0 %vm1390_vm1, %v1389_v1 }
 0x2af   :  { %1329 = vmatprep.subr.bf16.mxu0 %v1389_v1 }
 0x2b1   :  { %1322 = vmatmul.mubr.msk.f32.vlgmr.msra.gmra.mrb[14].mxu0 %vm507_vm9, %v1399_v14 }
 0x2b2   :  { %1335 = vmatprep.mubr.msk.bf16.mxu0 %vm1390_vm1, %v1389_v1  ;;  %1330 = vmatpush3.bf16.msra.mxu0 %v1382_v25  ;;  %v1078_v25 = vld [vmem:[%s1676_s10] sm:$0x1] }
 0x2b3   :  { %1331 = vmatprep.subr.bf16.mxu0 %v1389_v1 }
 0x2b6   :  { %1332 = vmatpush3.bf16.msra.mxu0 %v1383_v51 }
 0x2b7   :  { %1333 = vmatprep.subr.bf16.mxu0 %v1389_v1 }
 0x2ba   :  { %1334 = vmatpush3.bf16.msra.mxu0 %v1384_v55 }
 0x31e   :  { %v501_v15 = vpop.f32.mrb[8].mxu1 }
 0x31f   :  { %v502_v16 = vadd.f32 %v1197_v7, %v501_v15  ;;  %v1307_v17 = vpop.f32.mrb[9].mxu1 }
 0x320   :  { %v504_v18 = vpop.f32.mrb[10].mxu1 }
 0x321   :  { %v728_v19 = vmul.f32 %v502_v16, %v502_v16  ;;  %v1308_v20 = vpop.f32.mrb[11].mxu1  ;;  %1315 = vmatpush3.msra.mxu1 %v502_v16 }
 0x322   :  { %1317 = vmatmul.mubr.msk.f32.vlgmr.msra.gmra.mrb[12].mxu1 %vm507_vm9, %v1399_v14  ;;  %1324 = vmatprep.subr.mxu1 %v1389_v1 }
 0x323   :  { %1325 = vmatpush3.msra.mxu1 %v728_v19  ;;  %1326 = vmatprep.mubr.msk.f32.mxu1 %vm1390_vm1, %v1389_v1 }
 0x324   :  { %1339 = vmatprep.subr.mxu1 %v1389_v1 }
 0x326   :  { %1327 = vmatmul.mubr.msk.f32.vlgmr.msra.gmra.mrb[14].mxu1 %vm507_vm9, %v1399_v14 }
 0x327   :  { %1341 = vmatprep.mubr.msk.f32.mxu1 %vm1390_vm1, %v1389_v1 }
 0x380   :  { %v577_v21 = vpop.f32.mrb[12].mxu0 }
 0x381   :  { %v1313_v22 = vpop.f32.mrb[13].mxu0  ;;  %v582_v26 = vmul.f32 0.125, %v577_v21 }
 0x384   :  { %v723_v23 = vpop.f32.mrb[14].mxu0 }
 0x385   :  { %v1323_v24 = vpop.f32.mrb[15].mxu0  ;;  %v727_v31 = vmul.f32 0.125, %v723_v23 }
 0x3f5   :  { %v649_v27 = vpop.f32.mrb[12].mxu1 }
 0x3f6   :  { %v653_v28 = vmul.f32 0.125, %v649_v27  ;;  %v1318_v29 = vpop.f32.mrb[13].mxu1 }
 0x3f8   :  { %v654_v30 = vadd.f32 %v653_v28, %v582_v26 }
 0x3f9   :  { %v795_v32 = vpop.f32.mrb[14].mxu1 }
 0x3fa   :  { %v655_v33 = vmul.f32 0.5, %v654_v30  ;;  %v799_v34 = vmul.f32 0.125, %v795_v32  ;;  %v1328_v35 = vpop.f32.mrb[15].mxu1 }
 0x3fc   :  { %v800_v36 = vadd.f32 %v799_v34, %v727_v31  ;;  %v802_v37 = vmul.f32 %v655_v33, %v655_v33 }
 0x3fe   :  { %v801_v38 = vmul.f32 0.5, %v800_v36 }
 0x400   :  { %v803_v39 = vsub.f32 %v801_v38, %v802_v37  ;;  %v1100_v38 = vld [vmem:[%s1678_s14] sm:$0x1] }
 0x402   :  { %v804_v40 = vadd.f32 1e-05, %v803_v39  ;;  %v20_v39 = vstv %s1679_s13 }
 0x403   :  { %21 = vst [vmem:[#allocation5] sm:$0x1] %v20_v39 }
 0x404   :  { %1385 = vrsqrt.f32 %v804_v40  ;;  %v1217_v40 = vld [vmem:[%s1680_s12] ss:$0 sm:$0xff] }
 0x40e   :  { %v1386_v45 = vpop.eup %1385 }
 0x40f   :  { %v807_v46 = vmul.f32 %v1386_v45, %v806_v43 }
 0x411   :  { %v809_v48 = vmul.f32 %v807_v46, %v655_v33  ;;  %v814_v49 = vrot.slane %v807_v46, %v1612_v44 }
 0x413   :  { %v810_v50 = vsub.f32 %v808_v47, %v809_v48  ;;  %v825_v53 = vmul.f32 %v814_v49, %v502_v16  ;;  %v815_v54 = vmul.f32 %v814_v49, %v1580_v9  ;;  %v1209_v9 = vld [vmem:[%s1675_s9] ss:$0 sm:$0xff]  ;;  %v1218_v47 = vld [vmem:[#allocation5] ss:$0 sm:$0xff] }
 0x415   :  { %v820_v52 = vrot.slane %v810_v50, %v1612_v44 }
 0x417   :  { %v826_v56 = vadd.f32 %v825_v53, %v820_v52  ;;  %v822_v57 = vadd.f32 %v820_v52, %v815_v54 }
 0x419   :  { %v827_v58 = vmul.f32 0.2, %v826_v56  ;;  %v823_v60 = vmul.f32 0.2, %v822_v57 }
 0x41b   :  { %v828_v61 = vmax.f32 %v826_v56, %v827_v58  ;;  %v824_v62 = vmax.f32 %v822_v57, %v823_v60 }
 0x41d   :  { %v1224_v63 = vpack.c.bf16 %v828_v61, %v828_v61  ;;  %v1223_v0 = vpack.c.bf16 %v824_v62, %v824_v62  ;;  %v848_v2 = vrot.slane %v828_v61, 7 }
 0x41f   :  { %842 = vrot.lane.b32.xlu0 %v1224_v63, %s1398_s22  ;;  %833 = vrot.lane.b32.xlu1 %v1223_v0, %s1396_s21  ;;  %v850_v3 = vsel %vm382_vm4, 0.0, %v848_v2 }
 0x420   :  { %v851_v4 = vmul.f32 %v850_v3, %v1566_v59 }
 0x422   :  { %v852_v7 = vpack.c.bf16 %v851_v4, %v851_v4 }
 0x491   :  { %v843_v5 = vpop.permute.xlu0 %842  ;;  %v834_v6 = vpop.permute.xlu1 %833 }
 0x492   :  { %837 = vst.msk [vmem:[#allocation3] sm:$0xf] %vm836_vm10, %v834_v6 }
 0x493   :  { %846 = vst.msk [vmem:[#allocation3] sm:$0xf] %vm845_vm11, %v843_v5 }
 0x494   :  { %854 = vst.msk [vmem:[#allocation3] sm:$0xf] %vm853_vm12, %v852_v7 }
 0x49b   :  { %v855_v8 = vld [vmem:[#allocation3] sm:$0xf] }
 0x49c   :  { %1336 = vmatmul.mubr.msk.bf16.vlgmr.msra.gmra.mrb[16].mxu0 %vm887_vm13, %v855_v8 }
 0x56f   :  { %v925_v10 = vpop.f32.mrb[16].mxu0 }
 0x570   :  { %v926_v11 = vadd.f32 %v1209_v9, %v925_v10  ;;  %v1337_v12 = vpop.f32.mrb[17].mxu0 }
 0x571   :  { %v928_v59 = vpop.f32.mrb[18].mxu0 }
 0x572   :  { %v1002_v13 = vmul.f32 %v926_v11, %v926_v11  ;;  %v1338_v15 = vpop.f32.mrb[19].mxu0  ;;  %1340 = vmatpush3.msra.mxu1 %v926_v11 }
 0x573   :  { %1342 = vmatmul.mubr.msk.f32.vlgmr.msra.gmra.mrb[16].mxu1 %vm507_vm9, %v1399_v14  ;;  %1344 = vmatprep.subr.mxu1 %v1389_v1 }
 0x574   :  { %1345 = vmatpush3.msra.mxu1 %v1002_v13  ;;  %1346 = vmatprep.mubr.msk.f32.mxu1 %vm1390_vm1, %v1389_v1 }
 0x575   :  { %1349 = vmatprep.subr.bf16.mxu1 %v1389_v1 }
 0x577   :  { %1347 = vmatmul.mubr.msk.f32.vlgmr.msra.gmra.mrb[18].mxu1 %vm507_vm9, %v1399_v14 }
 0x578   :  { %1351 = vmatprep.mubr.msk.bf16.mxu1 %vm1390_vm1, %v1389_v1  ;;  %v1080_v1 = vld [vmem:[%s1677_s11] sm:$0x1] }
 0x646   :  { %v997_v16 = vpop.f32.mrb[16].mxu1 }
 0x647   :  { %v1001_v17 = vmul.f32 0.125, %v997_v16  ;;  %v1343_v18 = vpop.f32.mrb[17].mxu1 }
 0x649   :  { %v1074_v20 = vmul.f32 %v1001_v17, %v1001_v17 }
 0x64a   :  { %v1069_v19 = vpop.f32.mrb[18].mxu1 }
 0x64b   :  { %v1073_v21 = vmul.f32 0.125, %v1069_v19  ;;  %v1348_v22 = vpop.f32.mrb[19].mxu1 }
 0x64d   :  { %v1075_v23 = vsub.f32 %v1073_v21, %v1074_v20 }
 0x64f   :  { %v1076_v24 = vadd.f32 1e-05, %v1075_v23 }
 0x651   :  { %1387 = vrsqrt.f32 %v1076_v24 }
 0x65b   :  { %v1388_v26 = vpop.eup %1387 }
 0x65c   :  { %v1079_v27 = vmul.f32 %v1388_v26, %v1078_v25 }
 0x65e   :  { %v1081_v14 = vmul.f32 %v1079_v27, %v1001_v17  ;;  %v1086_v28 = vrot.slane %v1079_v27, %v1612_v44 }
 0x660   :  { %v1082_v29 = vsub.f32 %v1080_v1, %v1081_v14  ;;  %v1087_v30 = vmul.f32 %v1086_v28, %v926_v11 }
 0x662   :  { %v1092_v31 = vrot.slane %v1082_v29, %v1612_v44 }
 0x664   :  { %v1094_v32 = vadd.f32 %v1092_v31, %v1087_v30 }
 0x666   :  { %v1095_v33 = vmul.f32 0.2, %v1094_v32 }
 0x668   :  { %v1096_v34 = vmax.f32 %v1094_v32, %v1095_v33 }
 0x66a   :  { %v1097_v35 = vpack.c.bf16 %v1096_v34, %v1096_v34 }
 0x66c   :  { %1099 = vst.msk [vmem:[#allocation4] sm:$0xf] %vm1098_vm14, %v1097_v35 }
 0x673   :  { %v1101_v36 = vld [vmem:[#allocation4] sm:$0xf] }
 0x674   :  { %v1106_v37 = vsel %vm78_vm0, %v1101_v36, 0  ;;  %vm1168_vm0 = vcmask 1024  }
 0x675   :  { %1350 = vmatpush3.bf16.msra.mxu1 %v1106_v37 }
 0x678   :  { %1352 = vmatmul.mubr.msk.bf16.vlgmr.msra.gmra.mrb[20].mxu1 %vm507_vm9, %v1100_v38 }
 0x74b   :  { %v1142_v41 = vpop.f32.mrb[20].mxu1 }
 0x74c   :  { %v1155_v42 = vmul.f32 %v1217_v40, %v1142_v41  ;;  %v1353_v43 = vpop.f32.mrb[21].mxu1 }
 0x74d   :  { %v1145_v44 = vpop.f32.mrb[22].mxu1 }
 0x74e   :  { %v1354_v45 = vpop.f32.mrb[23].mxu1  ;;  %v1157_v46 = vsel %vm1156_vm15, %v1155_v42, 0.0 }
 0x74f   :  { %1158 = vadd.xlane.f32.xlu1 %v1157_v46 }
 0x7dc   :  { %v1159_v48 = vpop.xlane.xlu1 %1158 }
 0x7dd   :  { %v1167_v49 = vadd.f32 %v1218_v47, %v1159_v48 }
 0x7df   :  { %1169 = vst.msk [vmem:[%s1681_s15] sm:$0x3] %vm1168_vm0, %v1167_v49 }

</bundles_post_ra>
